<compile_context>
chip_gen: v5e
topology: v5e:2x2
jax: 0.10.0
libtpu: 0.0.40
codegen_flags: <defaults>
</compile_context>

<pallas_src>
import jax
import jax.numpy as jnp
from jax import lax
from jax.experimental import pallas as pl
from jax.experimental.pallas import tpu as pltpu


def _round_up(x, m):
    return ((x + m - 1) // m) * m


def _copy_slab_kernel(s_ref, src_ref, out_ref):
    """Slab selection happens entirely in the index_map (pure DMA addressing).

    s_ref:   SMEM scalar-prefetch ref, shape (1,), int32 (unused in the body).
    src_ref: VMEM ref, shape (TILE_S, padded_batch), int32 — selected slab.
    out_ref: VMEM ref, shape (TILE_S, padded_batch), int32 — lane-dense output.
    """
    del s_ref
    out_ref[...] = src_ref[...]


def _build_fetch_slab(tile_s, padded_batch, n_slabs, dtype=jnp.int32):
    """pallas_call that DMAs one (tile_s, padded_batch) slab of target_t."""
    fetch = pl.pallas_call(
        _copy_slab_kernel,
        out_shape=jax.ShapeDtypeStruct((tile_s, padded_batch), dtype),
        grid_spec=pltpu.PrefetchScalarGridSpec(
            num_scalar_prefetch=1,
            grid=(1,),
            in_specs=[
                # target_t_padded is (padded_seq, padded_batch);
                # fetch block row s (a full (tile_s, padded_batch) tile).
                pl.BlockSpec((tile_s, padded_batch), lambda i, s_ref: (s_ref[0], 0)),
            ],
            out_specs=pl.BlockSpec((tile_s, padded_batch), lambda i, s_ref: (0, 0)),
        ),
    )

    def fetch_slab(slab_idx, target_t_padded):
        # Clamp on-device so a bad slab index can never drive an OOB DMA.
        s = jnp.minimum(slab_idx, n_slabs - 1).astype(jnp.int32).reshape((1,))
        return fetch(s, target_t_padded)  # (tile_s, padded_batch)

    return jax.jit(fetch_slab)


def _build_select_row(batch, tile_s):
    """Per-step row select from the resident slab (no custom-call boundary)."""
    def select(slab, offset):
        off = jnp.minimum(offset, tile_s - 1).astype(jnp.int32)
        row = lax.dynamic_slice_in_dim(slab, off, 1, axis=0)  # (1, padded_batch)
        return row[0, :batch]                                  # (batch,)

    return jax.jit(select)


class PolicyFromTarget:
    """JAX/Pallas port of the PyTorch PolicyFromTarget module."""

    def __init__(self, target):
        target = jnp.asarray(target, dtype=jnp.int32)       # (batch, seq_len)
        self.target = target
        batch, seq_len = int(target.shape[0]), int(target.shape[1])
        self.batch = batch
        self.seq_len = seq_len

        # Slab geometry: sublane dim a multiple of 8, lane dim a multiple of 128.
        self._tile_s = min(128, _round_up(seq_len, 8))
        padded_seq = _round_up(seq_len, self._tile_s)
        padded_batch = _round_up(batch, 128)
        self._n_slabs = padded_seq // self._tile_s

        # Store transposed + padded: (padded_seq, padded_batch), batch on lanes.
        target_t = jnp.transpose(target)                     # (seq_len, batch)
        padded = jnp.zeros((padded_seq, padded_batch), dtype=jnp.int32)
        self.target_t_padded = padded.at[:seq_len, :batch].set(target_t)

        self._fetch_slab = _build_fetch_slab(
            self._tile_s, padded_batch, self._n_slabs, jnp.int32)
        self._select_row = _build_select_row(batch, self._tile_s)

        self.n = 0                # single (host-side) step counter
        self._slab = None         # device-resident slab served by the kernel
        self._slab_idx = -1

    def forward(self, logits):
        # `logits` is intentionally ignored, exactly like the PyTorch module.
        if self.n >= self.seq_len:
            raise StopIteration
        slab_idx, offset = divmod(self.n, self._tile_s)
        if slab_idx != self._slab_idx:
            # One Pallas call every TILE_S steps: full-tile, lane-dense DMA.
            self._slab = self._fetch_slab(slab_idx, self.target_t_padded)
            self._slab_idx = slab_idx
        out = self._select_row(self._slab, offset)            # (batch,) int32
        self.n += 1
        return out

    __call__ = forward


if __name__ == "__main__":
    key = jax.random.PRNGKey(0)
    k_target, k_logits = jax.random.split(key)

    batch = 2
    seq_len = 8
    num_actions = 32

    target = jax.random.randint(
        k_target, (batch, seq_len), minval=0, maxval=num_actions, dtype=jnp.int32
    )
    logits = jax.random.normal(k_logits, (batch, num_actions), dtype=jnp.float32)

    policy = PolicyFromTarget(target)

    ok = True
    for step in range(seq_len):
        out = jax.block_until_ready(policy(logits))
        expected = target[:, step]
        if out.shape != (batch,) or not bool(jnp.all(out == expected)):
            ok = False
            break

    # After exhausting the target, forward must raise StopIteration.
    if ok:
        try:
            policy(logits)
            ok = False
        except StopIteration:
            pass

    print("KERNEL_OK" if ok else "KERNEL_MISMATCH")
</pallas_src>

<mosaic_0001>
module attributes {stable_mosaic.version = 11 : i64} {
  func.func @_copy_slab_kernel(%arg0: i32, %arg1: memref<1xi32, #tpu.memory_space<smem>>, %arg2: memref<8x128xi32, #tpu.memory_space<vmem>>, %arg3: memref<8x128xi32, #tpu.memory_space<vmem>>) attributes {dimension_semantics = [#tpu.dimension_semantics<arbitrary>], iteration_bounds = array<i64: 1>, scalar_prefetch = 1 : i64, scratch_operands = 0 : i64, tpu.core_type = #tpu.core_type<tc>, window_params = [{transform_indices = @transform_0, window_bounds = array<i64: 8, 128>}, {pipeline_mode = #tpu.pipeline_mode<synchronous>, transform_indices = @transform_1, window_bounds = array<i64: 8, 128>}]} {
    %c0 = arith.constant 0 : index
    %c0_0 = arith.constant 0 : index
    %0 = vector.load %arg2[%c0, %c0_0] : memref<8x128xi32, #tpu.memory_space<vmem>>, vector<8x128xi32>
    %c0_1 = arith.constant 0 : index
    %c0_2 = arith.constant 0 : index
    %1 = vector.load %arg3[%c0_1, %c0_2] : memref<8x128xi32, #tpu.memory_space<vmem>>, vector<8x128xi32>
    tpu.vector_store %arg3[%c0_1, %c0_2], %0 {strides = array<i32>} : memref<8x128xi32, #tpu.memory_space<vmem>>, vector<8x128xi32>,
    return
  }
  func.func @transform_0(%arg0: i32, %arg1: memref<1xi32, #tpu.memory_space<smem>>) -> (i32, i32) {
    %c0 = arith.constant 0 : index
    %0 = memref.load %arg1[%c0] : memref<1xi32, #tpu.memory_space<smem>>
    %c0_i32 = arith.constant 0 : i32
    %c0_i32_0 = arith.constant 0 : i32
    return %0, %c0_i32 : i32, i32
  }
  func.func @transform_1(%arg0: i32, %arg1: memref<1xi32, #tpu.memory_space<smem>>) -> (i32, i32) {
    %c0_i32 = arith.constant 0 : i32
    %c0_i32_0 = arith.constant 0 : i32
    %c0_i32_1 = arith.constant 0 : i32
    return %c0_i32, %c0_i32_0 : i32, i32
  }
}

</mosaic_0001>

<bundles_post_ra>
// kernel: fetch_slab.1
= control target key start
LH: loop header
LB: loop body
LE: loop exit
PB: predicated region body
PF: predicated region fallthrough
CT: control target
= control target key end

     0   :  { %8 = vsyncpa [#allocation5], 0  ;;  %s137_s0 = inlined_call_operand.<no memory space> [shape: s32[1], index: 0, kind: input, shape index: {}]   ;;  %s138_s1 = inlined_call_operand.hbm [shape: s32[8,128], index: 1, kind: input, shape index: {}]   ;;  %s139_s2 = inlined_call_operand.hbm [shape: s32[8,128], index: 2, kind: output, shape index: {}]  }
   0x1   :  { %9 = vsyncpa [#allocation6], 0  ;;  %s50_s11 = sshll.u32 %s137_s0, 3  ;;  %s105_s15 = smov [#allocation4]  }
   0x2   :  { %s16_s14 = scalar_lea.hbm %s138_s1, %s50_s11  ;;  %s20_s16 = sshll.u32 %s105_s15, 4  ;;  %s21_s16 = int_to_ptr.vmem [resolvable:$true] %s20_s16 }
   0x3   :  { %s18_s17 = sshll.u32 %s16_s14, 4  ;;  %s57_s22 = scalar_lea.hbm %s138_s1, 8  ;;  %s19_s17 = int_to_ptr.hbm [resolvable:$true] %s18_s17 }
   0x4   :  { %s53_s18 = sshra.s32 %s19_s17, 4  ;;  %s54_s18 = int_to_ptr.hbm [resolvable:$true] %s53_s18 }
   0x5   :  { %s55_s19 = scalar_lea.hbm %s54_s18, 8  ;;  %p58_p1 = scmp.lt.s32.totalorder %s54_s18, %s138_s1 }
   0x6   :  { %p56_p0 = scmp.ne.s32.totalorder %s54_s18, %s55_s19  ;;  %p59_p2 = scmp.lt.s32.totalorder %s57_s22, %s55_s19 }
   0x8   :  { %p60_p3 = por %p59_p2, %p58_p1 }
   0xa   :  { %p61_p4 = pnand %p60_p3, %p56_p0 }
   0xc   :  { %64 = shalt.err (!%p61_p4)
}
   0xd   :  { %23 = dma.hbm_to_vmem [thread:$0]  %s19_s17, 128, %s21_s16, [#allocation5]  }
   0xe   :  { %101 = dma.done.wait [#allocation5], 128  }
   0xf   :  { %102 = vsyncadd [#allocation5], 4294967168  ;;  %s106_s0 = smov [#allocation7]   ;;  %s38_s28 = sshll.u32 %s139_s2, 4  ;;  %v29_v0 = vld [vmem:[#allocation4] sm:$0xff]  ;;  %s39_s28 = int_to_ptr.hbm [resolvable:$true] %s38_s28 }
  0x10   :  { %s36_s25 = sshll.u32 %s106_s0, 4  ;;  %30 = vst [vmem:[#allocation7] sm:$0xff] %v29_v0  ;;  %s37_s25 = int_to_ptr.vmem [resolvable:$true] %s36_s25 }
  0x11   :  { %41 = dma.vmem_to_hbm [thread:$0]  %s37_s25, 128, %s39_s28, [#allocation6]  }
  0x12   :  { %103 = dma.done.wait [#allocation6], 128  }
  0x13   :  { %104 = vsyncadd [#allocation6], 4294967168 }
  0x14   :  { %46 = vsyncpa [#allocation5], 1 }
  0x15   :  { %47 = vsyncpa [#allocation6], 1 }

</bundles_post_ra>
